<compile_context>
chip_gen: v7x
topology: tpu7x:2x2x1
jax: 0.10.0
libtpu: 0.0.40
codegen_flags: <defaults>
</compile_context>

<pallas_src>
import functools

import jax
import jax.numpy as jnp
from jax.experimental import pallas as pl
from jax.experimental.pallas import tpu as pltpu

IN_FEATURES = 28 * 28          # 784
NUM_CLASSES = 27
PADDED_CLASSES = 128           # lane-dense class dim
DEFAULT_TM = 1024              # batch tile; fits scoped VMEM on v5e/v6e/v7x


def _round_up(n, m):
    return ((n + m - 1) // m) * m


def _fc_logsoftmax_kernel(x_ref, w_ref, b_ref, o_ref):
    # x_ref: (TM, 784) bf16, w_ref: (784, 128) bf16, b_ref: (1, 128) f32,
    # o_ref: (TM, 128) f32
    logits = jnp.dot(x_ref[...], w_ref[...],
                     preferred_element_type=jnp.float32) + b_ref[...]
    # Mask the 101 padded class columns so they don't contaminate logsumexp.
    col = jax.lax.broadcasted_iota(jnp.int32, logits.shape, 1)
    logits = jnp.where(col < NUM_CLASSES, logits, jnp.float32(-1e30))
    # Numerically stable log_softmax over the class dim (all in f32).
    m = jnp.max(logits, axis=-1, keepdims=True)
    shifted = logits - m
    lse = jnp.log(jnp.sum(jnp.exp(shifted), axis=-1, keepdims=True))
    o_ref[...] = (shifted - lse).astype(o_ref.dtype)


def prepare_params(w, b):
    """One-time param prep: transpose, pad classes to 128, cast W to bf16."""
    w_t = w.T.astype(jnp.bfloat16)                                  # (784, 27)
    w_pad = jnp.zeros((IN_FEATURES, PADDED_CLASSES), jnp.bfloat16)
    w_pad = w_pad.at[:, :NUM_CLASSES].set(w_t)                      # (784, 128)
    b_pad = jnp.zeros((1, PADDED_CLASSES), jnp.float32)
    b_pad = b_pad.at[0, :NUM_CLASSES].set(b.astype(jnp.float32))    # (1, 128)
    return w_pad, b_pad


@functools.partial(jax.jit, static_argnames=("tm",))
def net_forward(x, w_pad, b_pad, *, tm=DEFAULT_TM):
    """x: (B, 1, 28, 28); w_pad: (784, 128) bf16; b_pad: (1, 128) f32.

    Returns (B, 27) f32 log-probabilities (matches PyTorch Net.forward).
    """
    bsz = x.shape[0]
    x_flat = x.reshape(bsz, -1).astype(jnp.bfloat16)                # (B, 784)

    # Batch tile: sublane/pack friendly, never larger than needed.
    tile_m = min(tm, _round_up(bsz, 16))
    padded_b = _round_up(bsz, tile_m)
    if padded_b != bsz:
        x_flat = jnp.pad(x_flat, ((0, padded_b - bsz), (0, 0)))
    grid = (padded_b // tile_m,)

    bytes_accessed = (padded_b * IN_FEATURES * 2            # x (bf16)
                      + IN_FEATURES * PADDED_CLASSES * 2    # W (bf16)
                      + PADDED_CLASSES * 4                  # b
                      + padded_b * PADDED_CLASSES * 4)      # out (f32)
    cost = pl.CostEstimate(
        flops=2 * padded_b * IN_FEATURES * PADDED_CLASSES,
        transcendentals=padded_b * PADDED_CLASSES,
        bytes_accessed=bytes_accessed,
    )

    out = pl.pallas_call(
        _fc_logsoftmax_kernel,
        out_shape=jax.ShapeDtypeStruct((padded_b, PADDED_CLASSES), jnp.float32),
        grid_spec=pltpu.PrefetchScalarGridSpec(
            num_scalar_prefetch=0,
            grid=grid,
            in_specs=[
                pl.BlockSpec((tile_m, IN_FEATURES), lambda i: (i, 0)),
                pl.BlockSpec((IN_FEATURES, PADDED_CLASSES), lambda i: (0, 0)),
                pl.BlockSpec((1, PADDED_CLASSES), lambda i: (0, 0)),
            ],
            out_specs=pl.BlockSpec((tile_m, PADDED_CLASSES), lambda i: (i, 0)),
        ),
        compiler_params=pltpu.CompilerParams(
            dimension_semantics=("parallel",)),
        cost_estimate=cost,
    )(x_flat, w_pad, b_pad)

    return out[:bsz, :NUM_CLASSES]


def init_params(key):
    # Deterministic init mimicking nn.Linear(784, 27):
    # uniform(-1/sqrt(784), 1/sqrt(784)) for both weight and bias.
    kw, kb = jax.random.split(key)
    bound = 1.0 / (28.0 * 28.0) ** 0.5
    w = jax.random.uniform(kw, (NUM_CLASSES, IN_FEATURES), jnp.float32,
                           -bound, bound)
    b = jax.random.uniform(kb, (NUM_CLASSES,), jnp.float32, -bound, bound)
    return w, b


if __name__ == "__main__":
    key = jax.random.PRNGKey(0)
    kx, kp = jax.random.split(key)
    batch = 2
    x = jax.random.normal(kx, (batch, 1, 28, 28), jnp.float32)
    w, b = init_params(kp)
    w_pad, b_pad = prepare_params(w, b)     # one-time, hoisted out of forward

    out = net_forward(x, w_pad, b_pad)
    jax.block_until_ready(out)

    # Pure-JAX f32 reference of the same math (kernel uses bf16 inputs with
    # f32 accumulation, so tolerance is bf16-level).
    ref_logits = x.reshape(batch, -1) @ w.T + b
    ref = jax.nn.log_softmax(ref_logits, axis=-1)
    assert out.shape == (batch, NUM_CLASSES)
    assert jnp.allclose(out, ref, atol=3e-2), "mismatch vs reference"
    print("KERNEL_OK")
</pallas_src>

<mosaic_0001>
module attributes {stable_mosaic.version = 11 : i64} {
  func.func @_fc_logsoftmax_kernel(%arg0: i32, %arg1: memref<16x784xbf16, #tpu.memory_space<vmem>>, %arg2: memref<784x128xbf16, #tpu.memory_space<vmem>>, %arg3: memref<1x128xf32, #tpu.memory_space<vmem>>, %arg4: memref<16x128xf32, #tpu.memory_space<vmem>>) attributes {dimension_semantics = [#tpu.dimension_semantics<parallel>], iteration_bounds = array<i64: 1>, scalar_prefetch = 0 : i64, scratch_operands = 0 : i64, tpu.core_type = #tpu.core_type<tc>, window_params = [{transform_indices = @transform_0, window_bounds = array<i64: 16, 784>}, {pipeline_mode = #tpu.pipeline_mode<synchronous>, transform_indices = @transform_1, window_bounds = array<i64: 784, 128>}, {pipeline_mode = #tpu.pipeline_mode<synchronous>, transform_indices = @transform_2, window_bounds = array<i64: 1, 128>}, {transform_indices = @transform_3, window_bounds = array<i64: 16, 128>}]} {
    %c0 = arith.constant 0 : index
    %c0_0 = arith.constant 0 : index
    %0 = vector.load %arg1[%c0, %c0_0] : memref<16x784xbf16, #tpu.memory_space<vmem>>, vector<16x784xbf16>
    %c0_1 = arith.constant 0 : index
    %c0_2 = arith.constant 0 : index
    %1 = vector.load %arg2[%c0_1, %c0_2] : memref<784x128xbf16, #tpu.memory_space<vmem>>, vector<784x128xbf16>
    %cst = arith.constant dense<0.000000e+00> : vector<16x128xf32>
    %2 = tpu.matmul %0, %1, %cst {dimension_numbers = #tpu.dot_dimension_numbers<[1], [0], [0], [1], [0, 0, 1, 1], [], []>} : vector<16x784xbf16>, vector<784x128xbf16>, vector<16x128xf32> -> vector<16x128xf32>
    %c0_3 = arith.constant 0 : index
    %c0_4 = arith.constant 0 : index
    %3 = vector.load %arg3[%c0_3, %c0_4] : memref<1x128xf32, #tpu.memory_space<vmem>>, vector<1x128xf32>
    %4 = vector.broadcast %3 : vector<1x128xf32> to vector<16x128xf32>
    %5 = arith.addf %2, %4 : vector<16x128xf32>
    %6 = tpu.iota {dimensions = array<i32: 1>} : vector<16x128xi32>
    %c27_i32 = arith.constant 27 : i32
    %7 = vector.broadcast %c27_i32 : i32 to vector<16x128xi32>
    %8 = arith.cmpi slt, %6, %7 : vector<16x128xi32>
    %cst_5 = arith.constant -1.000000e+30 : f32
    %9 = vector.broadcast %cst_5 : f32 to vector<16x128xf32>
    %10 = arith.select %8, %5, %9 : vector<16x128xi1>, vector<16x128xf32>
    %cst_6 = arith.constant dense<0xFF800000> : vector<16xf32>
    %11 = vector.multi_reduction <maximumf>, %10, %cst_6 [1] : vector<16x128xf32> to vector<16xf32>
    %12 = vector.shape_cast %11 : vector<16xf32> to vector<16x1xf32>
    %13 = vector.broadcast %12 : vector<16x1xf32> to vector<16x128xf32>
    %14 = arith.subf %10, %13 : vector<16x128xf32>
    %15 = math.exp %14 : vector<16x128xf32>
    %cst_7 = arith.constant dense<0.000000e+00> : vector<16xf32>
    %16 = vector.multi_reduction <add>, %15, %cst_7 [1] : vector<16x128xf32> to vector<16xf32>
    %17 = vector.shape_cast %16 : vector<16xf32> to vector<16x1xf32>
    %18 = math.log %17 : vector<16x1xf32>
    %19 = vector.broadcast %18 : vector<16x1xf32> to vector<16x128xf32>
    %20 = arith.subf %14, %19 : vector<16x128xf32>
    %c0_8 = arith.constant 0 : index
    %c0_9 = arith.constant 0 : index
    %21 = vector.load %arg4[%c0_8, %c0_9] : memref<16x128xf32, #tpu.memory_space<vmem>>, vector<16x128xf32>
    tpu.vector_store %arg4[%c0_8, %c0_9], %20 {strides = array<i32>} : memref<16x128xf32, #tpu.memory_space<vmem>>, vector<16x128xf32>,
    return
  }
  func.func @transform_0(%arg0: i32) -> (i32, i32) {
    %c0_i32 = arith.constant 0 : i32
    %c0_i32_0 = arith.constant 0 : i32
    return %arg0, %c0_i32 : i32, i32
  }
  func.func @transform_1(%arg0: i32) -> (i32, i32) {
    %c0_i32 = arith.constant 0 : i32
    %c0_i32_0 = arith.constant 0 : i32
    %c0_i32_1 = arith.constant 0 : i32
    return %c0_i32, %c0_i32_0 : i32, i32
  }
  func.func @transform_2(%arg0: i32) -> (i32, i32) {
    %c0_i32 = arith.constant 0 : i32
    %c0_i32_0 = arith.constant 0 : i32
    %c0_i32_1 = arith.constant 0 : i32
    return %c0_i32, %c0_i32_0 : i32, i32
  }
  func.func @transform_3(%arg0: i32) -> (i32, i32) {
    %c0_i32 = arith.constant 0 : i32
    %c0_i32_0 = arith.constant 0 : i32
    return %arg0, %c0_i32 : i32, i32
  }
}

</mosaic_0001>

<bundles_post_ra>
// kernel: net_forward.1
= control target key start
LH: loop header
LB: loop body
LE: loop exit
PB: predicated region body
PF: predicated region fallthrough
CT: control target
= control target key end

     0   :  { %8 = vsyncpa [#allocation3], 0  ;;  %s899_s12 = smov [#allocation2]   ;;  %s966_s0 = inlined_call_operand.vmem [shape: bf16[16,784], index: 0, kind: input, shape index: {}]   ;;  %s967_s1 = inlined_call_operand.hbm [shape: bf16[784,128], index: 1, kind: input, shape index: {}]   ;;  %s968_s2 = inlined_call_operand.vmem [shape: f32[1,128], index: 2, kind: input, shape index: {}]   ;;  %s969_s3 = inlined_call_operand.vmem [shape: f32[16,128], index: 3, kind: output, shape index: {}]  }
   0x1   :  { %s16_s13 = sshll.u32 %s899_s12, 4  ;;  %s875_s16 = scalar_lea.hbm %s967_s1, 6272  ;;  %s17_s13 = int_to_ptr.vmem [resolvable:$true] %s16_s13 }
   0x2   :  { %p876_p0 = scmp.ne.s32.totalorder %s967_s1, %s875_s16  ;;  %p879_p1 = scmp.lt.u32.totalorder %s875_s16, %s967_s1 }
   0x4   :  { %p881_p2 = pnand %p879_p1, %p876_p0 }
   0x6   :  { %884 = shalt.err (!%p881_p2)
}
   0x7   :  { %s885_s21 = scalar_lea.vmem %s17_s13, 6272  ;;  %p890_p4 = scmp.lt.s32.totalorder %s17_s13, %s17_s13 }
   0x8   :  { %p886_p3 = scmp.ne.s32.totalorder %s17_s13, %s885_s21  ;;  %p891_p5 = scmp.lt.s32.totalorder %s885_s21, %s885_s21 }
   0xa   :  { %p892_p6 = por %p891_p5, %p890_p4 }
   0xc   :  { %p893_p7 = pnand %p892_p6, %p886_p3 }
   0xe   :  { %896 = shalt.err (!%p893_p7)
}
   0xf   :  { %s900_s22 = smov 64   ;;  %s901_s23 = smov 4  }
  0x10   :  { %22 = dma.hbm_to_vmem [thread:$0]  %s967_s1, 6272, %s17_s13, [#allocation3], %s900_s22, %s900_s22, %s901_s23  }
  0x11   :  { %897 = dma.done.wait [#allocation3], 6272  }
  0x12   :  { %898 = vsyncadd [#allocation3], 4294961024  ;;  %v808_v0 = vld [vmem:[#allocation2 + $0x40] sm:$0xff]   ;;  %v812_v4 = vld [vmem:[#allocation2 + $0x48] sm:$0xff]   ;;  %v902_v38 = vmov 0.0   ;;  %vm903_vm0 = vmmov 0  }
  0x13   :  { %v809_v1 = vld [vmem:[#allocation2] sm:$0xff]   ;;  %729 = vmatprep.subr.bf16.mxu0 %v808_v0  ;;  %v813_v5 = vld [vmem:[#allocation2 + $0x8] sm:$0xff]   ;;  %v816_v8 = vld [vmem:[#allocation2 + $0x50] sm:$0xff]   ;;  %vm471_vm1 = vcmask 130048  }
  0x14   :  { %v810_v2 = vld [vmem:[#allocation2 + $0xc0] sm:$0xff]   ;;  %730 = vmatpush3.bf16.msra.mxu0 %v809_v1  ;;  %v814_v6 = vld [vmem:[#allocation2 + $0xc8] sm:$0xff]   ;;  %v817_v9 = vld [vmem:[#allocation2 + $0x10] sm:$0xff]  }
  0x15   :  { %v811_v3 = vld [vmem:[#allocation2 + $0x80] sm:$0xff]   ;;  %751 = vmatprep.subr.bf16.mxu1 %v810_v2  ;;  %731 = vmatprep.subr.bf16.mxu0 %v812_v4  ;;  %v815_v7 = vld [vmem:[#allocation2 + $0x88] sm:$0xff]   ;;  %v818_v10 = vld [vmem:[#allocation2 + $0xd0] sm:$0xff]  }
  0x16   :  { %752 = vmatpush3.bf16.msra.mxu1 %v811_v3  ;;  %v819_v11 = vld [vmem:[#allocation2 + $0x90] sm:$0xff]   ;;  %v820_v12 = vld [vmem:[#allocation2 + $0x58] sm:$0xff]   ;;  %v824_v16 = vld [vmem:[#allocation2 + $0x60] sm:$0xff]  }
  0x17   :  { %753 = vmatprep.subr.bf16.mxu1 %v814_v6  ;;  %v821_v13 = vld [vmem:[#allocation2 + $0x18] sm:$0xff]   ;;  %v825_v17 = vld [vmem:[#allocation2 + $0x20] sm:$0xff]   ;;  %v828_v20 = vld [vmem:[#allocation2 + $0x68] sm:$0xff]  }
  0x18   :  { %732 = vmatpush3.bf16.msra.mxu0 %v813_v5  ;;  %v822_v14 = vld [vmem:[#allocation2 + $0xd8] sm:$0xff]   ;;  %v826_v18 = vld [vmem:[#allocation2 + $0xe0] sm:$0xff]   ;;  %v829_v21 = vld [vmem:[#allocation2 + $0x28] sm:$0xff]  }
  0x19   :  { %733 = vmatprep.subr.bf16.mxu0 %v816_v8  ;;  %v823_v15 = vld [vmem:[#allocation2 + $0x98] sm:$0xff]   ;;  %v827_v19 = vld [vmem:[#allocation2 + $0xa0] sm:$0xff]   ;;  %v830_v22 = vld [vmem:[#allocation2 + $0xe8] sm:$0xff]  }
  0x1a   :  { %754 = vmatpush3.bf16.msra.mxu1 %v815_v7  ;;  %v831_v23 = vld [vmem:[#allocation2 + $0xa8] sm:$0xff]   ;;  %v832_v24 = vld [vmem:[#allocation2 + $0x70] sm:$0xff]   ;;  %v836_v28 = vld [vmem:[#allocation2 + $0x78] sm:$0xff]  }
  0x1b   :  { %755 = vmatprep.subr.bf16.mxu1 %v818_v10  ;;  %v833_v25 = vld [vmem:[#allocation2 + $0x30] sm:$0xff]   ;;  %v837_v29 = vld [vmem:[#allocation2 + $0x38] sm:$0xff]   ;;  %v841_v32 = vld [vmem:[%s966_s0 + $0x4] ss:$28 sps:$4 sm:$0xff]  }
  0x1c   :  { %734 = vmatpush3.bf16.msra.mxu0 %v817_v9  ;;  %v834_v26 = vld [vmem:[#allocation2 + $0xf0] sm:$0xff]   ;;  %v838_v30 = vld [vmem:[#allocation2 + $0xf8] sm:$0xff]   ;;  %507 = vmatprep.mubr.bf16.mxu0 %v841_v32  ;;  %v843_v34 = vld [vmem:[#allocation2 + $0x140] sm:$0xff]  }
  0x1d   :  { %735 = vmatprep.subr.bf16.mxu0 %v820_v12  ;;  %v835_v27 = vld [vmem:[#allocation2 + $0xb0] sm:$0xff]   ;;  %v839_v31 = vld [vmem:[%s966_s0] ss:$28 sps:$4 sm:$0xff]   ;;  %v844_v35 = vld [vmem:[%s966_s0 + $0x8] ss:$28 sps:$4 sm:$0xff]  }
  0x1e   :  { %756 = vmatpush3.bf16.msra.mxu1 %v819_v11  ;;  %v842_v33 = vld [vmem:[#allocation2 + $0xb8] sm:$0xff]   ;;  %v846_v36 = vld [vmem:[%s966_s0 + $0xc] ss:$28 sps:$4 sm:$0xff]   ;;  %v847_v37 = vld [vmem:[#allocation2 + $0x100] sm:$0xff]  }
  0x1f   :  { %757 = vmatprep.subr.bf16.mxu1 %v822_v14  ;;  %548 = vmatprep.mubr.bf16.mxu1 %v846_v36  ;;  %v848_v39 = vld [vmem:[#allocation2 + $0x148] sm:$0xff]   ;;  %v850_v41 = vld [vmem:[#allocation2 + $0x150] sm:$0xff]   ;;  %v852_v43 = vld [vmem:[#allocation2 + $0x158] sm:$0xff]   ;;  %v639_v14 = vlaneseq }
  0x20   :  { %736 = vmatpush3.bf16.msra.mxu0 %v821_v13  ;;  %v849_v40 = vld [vmem:[#allocation2 + $0x108] sm:$0xff]   ;;  %v851_v42 = vld [vmem:[#allocation2 + $0x110] sm:$0xff]   ;;  %v853_v44 = vld [vmem:[#allocation2 + $0x118] sm:$0xff]  }
  0x21   :  { %737 = vmatprep.subr.bf16.mxu0 %v824_v16  ;;  %v854_v45 = vld [vmem:[#allocation2 + $0x160] sm:$0xff]   ;;  %v856_v47 = vld [vmem:[#allocation2 + $0x168] sm:$0xff]   ;;  %v865_v49 = vld [vmem:[%s966_s0 + $0x14] ss:$28 sps:$4 sm:$0xff]  }
  0x22   :  { %758 = vmatpush3.bf16.msra.mxu1 %v823_v15  ;;  %v855_v46 = vld [vmem:[#allocation2 + $0x120] sm:$0xff]   ;;  %v866_v50 = vld [vmem:[%s966_s0 + $0x18] ss:$28 sps:$4 sm:$0xff]   ;;  %v857_v51 = vld [vmem:[#allocation2 + $0x128] sm:$0xff]  }
  0x23   :  { %759 = vmatprep.subr.bf16.mxu1 %v826_v18  ;;  %v862_v48 = vld [vmem:[#allocation2 + $0x180] sm:$0xff]   ;;  %v858_v52 = vld [vmem:[#allocation2 + $0x170] sm:$0xff]   ;;  %v860_v54 = vld [vmem:[#allocation2 + $0x178] sm:$0xff]  }
  0x24   :  { %738 = vmatpush3.bf16.msra.mxu0 %v825_v17  ;;  %v859_v53 = vld [vmem:[#allocation2 + $0x130] sm:$0xff]   ;;  %v861_v55 = vld [vmem:[#allocation2 + $0x138] sm:$0xff]   ;;  %v671_v58 = vld [vmem:[%s968_s2] ss:$0 sm:$0xff]  ;;  %v640_v17 = vand.u32 127, %v639_v14 }
  0x25   :  { %739 = vmatprep.subr.bf16.mxu0 %v828_v20  ;;  %v863_v56 = vld [vmem:[%s966_s0 + $0x10] ss:$28 sps:$4 sm:$0xff]  }
  0x26   :  { %760 = vmatpush3.bf16.msra.mxu1 %v827_v19  ;;  %vm641_vm2 = vcmp.lt.s32.totalorder %v640_v17, 27 }
  0x27   :  { %761 = vmatprep.subr.bf16.mxu1 %v830_v22 }
  0x28   :  { %740 = vmatpush3.bf16.msra.mxu0 %v829_v21 }
  0x29   :  { %741 = vmatprep.subr.bf16.mxu0 %v832_v24 }
  0x2a   :  { %762 = vmatpush3.bf16.msra.mxu1 %v831_v23 }
  0x2b   :  { %763 = vmatprep.subr.bf16.mxu1 %v834_v26 }
  0x2c   :  { %742 = vmatpush3.bf16.msra.mxu0 %v833_v25 }
  0x2d   :  { %743 = vmatprep.subr.bf16.mxu0 %v836_v28 }
  0x2e   :  { %764 = vmatpush3.bf16.msra.mxu1 %v835_v27 }
  0x2f   :  { %765 = vmatprep.subr.bf16.mxu1 %v838_v30 }
  0x30   :  { %744 = vmatpush3.bf16.msra.mxu0 %v837_v29 }
  0x31   :  { %773 = vmatprep.subr.bf16.mxu0 %v843_v34 }
  0x32   :  { %766 = vmatpush3.bf16.msra.mxu1 %v842_v33 }
  0x33   :  { %508 = vmatmul.mubr.bf16.vlgmr.msra.gmra.mrb[0].mxu0 %v839_v31  ;;  %797 = vmatprep.subr.bf16.mxu1 %v902_v38 }
  0x34   :  { %774 = vmatpush3.bf16.msra.mxu0 %v847_v37  ;;  %589 = vmatprep.mubr.bf16.mxu0 %v865_v49 }
  0x35   :  { %549 = vmatmul.mubr.bf16.vlgmr.msra.gmra.mrb[0].mxu1 %v844_v35  ;;  %775 = vmatprep.subr.bf16.mxu0 %v848_v39 }
  0x36   :  { %799 = vmatprep.mubr.msk.bf16.mxu1 %vm903_vm0, %v902_v38  ;;  %798 = vmatpush3.bf16.msra.mxu1 %v862_v48 }
  0x38   :  { %776 = vmatpush3.bf16.msra.mxu0 %v849_v40 }
  0x39   :  { %777 = vmatprep.subr.bf16.mxu0 %v850_v41 }
  0x3c   :  { %778 = vmatpush3.bf16.msra.mxu0 %v851_v42 }
  0x3d   :  { %779 = vmatprep.subr.bf16.mxu0 %v852_v43  ;;  %800 = vmatmul.mubr.msk.bf16.vlgmr.msra.gmra.mrb[4].mxu1 %vm471_vm1, %v866_v50 }
  0x40   :  { %780 = vmatpush3.bf16.msra.mxu0 %v853_v44 }
  0x41   :  { %781 = vmatprep.subr.bf16.mxu0 %v854_v45 }
  0x44   :  { %782 = vmatpush3.bf16.msra.mxu0 %v855_v46 }
  0x45   :  { %783 = vmatprep.subr.bf16.mxu0 %v856_v47 }
  0x48   :  { %784 = vmatpush3.bf16.msra.mxu0 %v857_v51 }
  0x49   :  { %785 = vmatprep.subr.bf16.mxu0 %v858_v52 }
  0x4c   :  { %786 = vmatpush3.bf16.msra.mxu0 %v859_v53 }
  0x4d   :  { %787 = vmatprep.subr.bf16.mxu0 %v860_v54 }
  0x50   :  { %788 = vmatpush3.bf16.msra.mxu0 %v861_v55 }
  0x53   :  { %590 = vmatmul.mubr.bf16.vlgmr.msra.gmra.mrb[4].mxu0 %v863_v56 }
 0x106   :  { %v745_v57 = vpop.f32.mrb[0].mxu0 }
 0x107   :  { %v746_v59 = vpop.f32.mrb[1].mxu0 }
 0x108   :  { %v747_v60 = vadd.f32 %v746_v59, %v745_v57  ;;  %v748_v61 = vpop.f32.mrb[2].mxu0  ;;  %v767_v62 = vpop.f32.mrb[0].mxu1 }
 0x109   :  { %v749_v63 = vpop.f32.mrb[3].mxu0  ;;  %v768_v2 = vpop.f32.mrb[1].mxu1 }
 0x10a   :  { %v510_v0 = vadd.f32 %v747_v60, %v671_v58  ;;  %v750_v1 = vadd.f32 %v749_v63, %v748_v61  ;;  %v769_v3 = vadd.f32 %v768_v2, %v767_v62  ;;  %v770_v4 = vpop.f32.mrb[2].mxu1 }
 0x10b   :  { %v771_v6 = vpop.f32.mrb[3].mxu1 }
 0x10c   :  { %v513_v5 = vadd.f32 %v750_v1, %v671_v58  ;;  %v551_v7 = vadd.f32 %v769_v3, %v510_v0  ;;  %v772_v8 = vadd.f32 %v771_v6, %v770_v4 }
 0x10e   :  { %v554_v9 = vadd.f32 %v772_v8, %v513_v5 }
 0x110   :  { %v632_v10 = vpop.f32.mrb[4].mxu1 }
 0x111   :  { %v801_v11 = vpop.f32.mrb[5].mxu1 }
 0x112   :  { %v635_v12 = vpop.f32.mrb[6].mxu1 }
 0x113   :  { %v802_v13 = vpop.f32.mrb[7].mxu1 }
 0x126   :  { %v789_v15 = vpop.f32.mrb[4].mxu0 }
 0x127   :  { %v790_v16 = vpop.f32.mrb[5].mxu0 }
 0x128   :  { %v791_v18 = vadd.f32 %v790_v16, %v789_v15  ;;  %v792_v19 = vpop.f32.mrb[6].mxu0 }
 0x129   :  { %v793_v20 = vpop.f32.mrb[7].mxu0 }
 0x12a   :  { %v592_v21 = vadd.f32 %v791_v18, %v551_v7  ;;  %v794_v22 = vadd.f32 %v793_v20, %v792_v19 }
 0x12c   :  { %v633_v23 = vadd.f32 %v632_v10, %v592_v21  ;;  %v595_v24 = vadd.f32 %v794_v22, %v554_v9 }
 0x12e   :  { %v636_v25 = vadd.f32 %v635_v12, %v595_v24  ;;  %v642_v26 = vsel %vm641_vm2, %v633_v23, -1e+30 }
 0x12f   :  { %644 = vmax.xlane.f32.xlu0 %v642_v26 }
 0x130   :  { %v643_v27 = vsel %vm641_vm2, %v636_v25, -1e+30 }
 0x133   :  { %646 = vmax.xlane.f32.xlu0 %v643_v27 }
 0x1bc   :  { %v645_v28 = vpop.xlane.xlu0 %644 }
 0x1bd   :  { %v648_v29 = vsub.f32 %v642_v26, %v645_v28 }
 0x1bf   :  { %v650_v30 = vmul.f32 1.442695, %v648_v29 }
 0x1c0   :  { %v647_v31 = vpop.xlane.xlu0 %646 }
 0x1c1   :  { %v649_v32 = vsub.f32 %v643_v27, %v647_v31  ;;  %867 = vpow2.f32 %v650_v30 }
 0x1c3   :  { %v652_v33 = vmul.f32 1.442695, %v649_v32 }
 0x1c5   :  { %869 = vpow2.f32 %v652_v33 }
 0x1cb   :  { %v868_v34 = vpop.eup %867 }
 0x1cc   :  { %654 = vadd.xlane.f32.xlu1 %v868_v34 }
 0x1cf   :  { %v870_v35 = vpop.eup %869 }
 0x1d0   :  { %656 = vadd.xlane.f32.xlu1 %v870_v35 }
 0x259   :  { %v655_v36 = vpop.xlane.xlu1 %654 }
 0x25a   :  { %871 = vlog2.f32 %v655_v36 }
 0x25d   :  { %v657_v37 = vpop.xlane.xlu1 %656 }
 0x25e   :  { %873 = vlog2.f32 %v657_v37 }
 0x264   :  { %v872_v38 = vpop.eup %871 }
 0x265   :  { %v659_v39 = vmul.f32 0.6931472, %v872_v38 }
 0x267   :  { %v662_v40 = vsub.f32 %v648_v29, %v659_v39 }
 0x268   :  { %v874_v41 = vpop.eup %873 }
 0x269   :  { %664 = vst [vmem:[%s969_s3] sm:$0xff] %v662_v40  ;;  %v661_v42 = vmul.f32 0.6931472, %v874_v41 }
 0x26b   :  { %v663_v43 = vsub.f32 %v649_v32, %v661_v42 }
 0x26d   :  { %665 = vst [vmem:[%s969_s3 + $0x8] sm:$0xff] %v663_v43 }
 0x26e   :  { %670 = vsyncpa [#allocation3], 1 }

</bundles_post_ra>
